<compile_context>
chip_gen: v5e
topology: v5e:2x2
jax: 0.10.0
libtpu: 0.0.40
codegen_flags: <defaults>
</compile_context>

<pallas_src>
import jax
import jax.numpy as jnp
from jax.experimental import pallas as pl
from jax.experimental.pallas import tpu as pltpu


def _h_swish_kernel(x_ref, o_ref):
    x = x_ref[...]
    # h_sigmoid(x) = relu6(x + 3) / 6, computed in the input dtype.
    hsig = jnp.clip(x + 3.0, 0.0, 6.0) * (1.0 / 6.0)
    o_ref[...] = (x * hsig).astype(o_ref.dtype)


def _h_swish_jnp(x):
    # Pure-jnp fallback for unaligned / tiny inputs: elementwise, already at
    # HBM roofline once XLA fuses it; avoids any pad/slice copies.
    return x * (jnp.clip(x + 3.0, 0.0, 6.0) * (1.0 / 6.0))


def _round_up(v: int, m: int) -> int:
    return ((v + m - 1) // m) * m


def h_swish(x: jax.Array, *, block_rows: int = 2048, max_lane: int = 512) -> jax.Array:
    """Elementwise hard-swish. Accepts any shape (NCHW for the reference module)."""
    orig_shape = x.shape
    dtype = x.dtype
    n = x.size
    if n == 0:
        return x

    # Widest lane-dense last dim (multiple of 128) that divides n, so no
    # padding copy is needed.
    lane = 0
    for cand in (max_lane, 256, 128):
        if cand <= max_lane and n % cand == 0:
            lane = cand
            break
    if lane == 0:
        # Non-128-aligned element count: no pad+slice round trips, just fused jnp.
        return _h_swish_jnp(x)

    rows = n // lane
    x2d = x.reshape(rows, lane)  # free for contiguous inputs

    if rows <= 16:
        # Tiny input: a full-extent block is always a legal block shape.
        br = rows
    else:
        # Aim for >= ~4 grid steps so the DMA pipeline overlaps and v7x can
        # shard steps across its two TensorCores; blocks stay sublane-aligned.
        target = max(16, _round_up(pl.cdiv(rows, 4), 16))
        br = min(block_rows, target)
    grid = (pl.cdiv(rows, br),)  # partial last block is masked by Pallas

    itemsize = jnp.dtype(dtype).itemsize
    # 2 input + 2 output double-buffers, plus a little headroom; cap below
    # v7x's 64 MiB physical VMEM per TensorCore.
    vmem_limit = max(16 << 20, min(4 * br * lane * itemsize + (2 << 20), 48 << 20))

    out2d = pl.pallas_call(
        _h_swish_kernel,
        out_shape=jax.ShapeDtypeStruct((rows, lane), dtype),
        grid_spec=pltpu.PrefetchScalarGridSpec(
            num_scalar_prefetch=0,
            grid=grid,
            in_specs=[pl.BlockSpec((br, lane), lambda i: (i, 0))],
            out_specs=pl.BlockSpec((br, lane), lambda i: (i, 0)),
        ),
        compiler_params=pltpu.CompilerParams(
            dimension_semantics=("parallel",),
            vmem_limit_bytes=int(vmem_limit),
        ),
        cost_estimate=pl.CostEstimate(
            flops=4 * n, transcendentals=0, bytes_accessed=2 * n * itemsize
        ),
    )(x2d)

    return out2d.reshape(orig_shape)


def _h_swish_ref(x):
    return x * (jnp.clip(x + 3.0, 0.0, 6.0) / 6.0)


if __name__ == "__main__":
    key = jax.random.PRNGKey(0)

    # NCHW conv-style input: batch=2, channels=4, spatial=16x16 (128-aligned path).
    x = jax.random.normal(key, (2, 4, 16, 16), dtype=jnp.float32) * 4.0
    y = h_swish(x)
    jax.block_until_ready(y)
    y_ref = _h_swish_ref(x)
    assert y.shape == x.shape and y.dtype == x.dtype
    assert jnp.allclose(y, y_ref, atol=1e-5, rtol=1e-5)

    # Larger input exercises the multi-step pipelined grid (>= 4 steps).
    x1 = jax.random.normal(jax.random.PRNGKey(2), (8, 32, 64, 64), dtype=jnp.float32) * 4.0
    y1 = h_swish(x1)
    jax.block_until_ready(y1)
    assert jnp.allclose(y1, _h_swish_ref(x1), atol=1e-5, rtol=1e-5)

    # Non-128-aligned shape exercises the fused-jnp fallback path.
    x2 = jax.random.normal(jax.random.PRNGKey(1), (3, 5, 7, 11), dtype=jnp.float32) * 4.0
    y2 = h_swish(x2)
    jax.block_until_ready(y2)
    assert y2.shape == x2.shape and y2.dtype == x2.dtype
    assert jnp.allclose(y2, _h_swish_ref(x2), atol=1e-5, rtol=1e-5)

    print("KERNEL_OK")
</pallas_src>

<mosaic_0001>
module attributes {stable_mosaic.version = 11 : i64} {
  func.func @_h_swish_kernel(%arg0: i32, %arg1: memref<4x512xf32, #tpu.memory_space<vmem>>, %arg2: memref<4x512xf32, #tpu.memory_space<vmem>>) attributes {dimension_semantics = [#tpu.dimension_semantics<parallel>], iteration_bounds = array<i64: 1>, scalar_prefetch = 0 : i64, scratch_operands = 0 : i64, tpu.core_type = #tpu.core_type<tc>, window_params = [{transform_indices = @transform_0, window_bounds = array<i64: 4, 512>}, {transform_indices = @transform_1, window_bounds = array<i64: 4, 512>}]} {
    %c0 = arith.constant 0 : index
    %c0_0 = arith.constant 0 : index
    %0 = vector.load %arg1[%c0, %c0_0] : memref<4x512xf32, #tpu.memory_space<vmem>>, vector<4x512xf32>
    %cst = arith.constant 3.000000e+00 : f32
    %1 = vector.broadcast %cst : f32 to vector<4x512xf32>
    %2 = arith.addf %0, %1 : vector<4x512xf32>
    %cst_1 = arith.constant 0.000000e+00 : f32
    %cst_2 = arith.constant 6.000000e+00 : f32
    %3 = vector.broadcast %cst_1 : f32 to vector<4x512xf32>
    %4 = arith.maximumf %3, %2 : vector<4x512xf32>
    %5 = vector.broadcast %cst_2 : f32 to vector<4x512xf32>
    %6 = arith.minimumf %5, %4 : vector<4x512xf32>
    %cst_3 = arith.constant 0.166666672 : f32
    %7 = vector.broadcast %cst_3 : f32 to vector<4x512xf32>
    %8 = arith.mulf %6, %7 : vector<4x512xf32>
    %9 = arith.mulf %0, %8 : vector<4x512xf32>
    %c0_4 = arith.constant 0 : index
    %c0_5 = arith.constant 0 : index
    %10 = vector.load %arg2[%c0_4, %c0_5] : memref<4x512xf32, #tpu.memory_space<vmem>>, vector<4x512xf32>
    tpu.vector_store %arg2[%c0_4, %c0_5], %9 {strides = array<i32>} : memref<4x512xf32, #tpu.memory_space<vmem>>, vector<4x512xf32>,
    return
  }
  func.func @transform_0(%arg0: i32) -> (i32, i32) {
    %c0_i32 = arith.constant 0 : i32
    %c0_i32_0 = arith.constant 0 : i32
    return %arg0, %c0_i32 : i32, i32
  }
  func.func @transform_1(%arg0: i32) -> (i32, i32) {
    %c0_i32 = arith.constant 0 : i32
    %c0_i32_0 = arith.constant 0 : i32
    return %arg0, %c0_i32 : i32, i32
  }
}

</mosaic_0001>

<bundles_post_ra>
// kernel: tpu_custom_call.1
= control target key start
LH: loop header
LB: loop body
LE: loop exit
PB: predicated region body
PF: predicated region fallthrough
CT: control target
= control target key end

     0   :  { %6 = vsyncpa [#allocation3], 0  ;;  %s126_s0 = inlined_call_operand.hbm [shape: f32[4,512], index: 0, kind: input, shape index: {}]   ;;  %s127_s1 = inlined_call_operand.hbm [shape: f32[4,512], index: 1, kind: output, shape index: {}]  }
   0x1   :  { %7 = vsyncpa [#allocation4], 0  ;;  %s13_s8 = sshll.u32 %s126_s0, 4  ;;  %s108_s9 = smov [#allocation2]   ;;  %s14_s8 = int_to_ptr.hbm [resolvable:$true] %s13_s8 }
   0x2   :  { %s15_s10 = sshll.u32 %s108_s9, 4  ;;  %s16_s10 = int_to_ptr.vmem [resolvable:$true] %s15_s10 }
   0x3   :  { %18 = dma.hbm_to_vmem [thread:$0]  %s14_s8, 256, %s16_s10, [#allocation3]  }
   0x4   :  { %104 = dma.done.wait [#allocation3], 256  }
   0x5   :  { %105 = vsyncadd [#allocation3], 4294967040  ;;  %v23_v0 = vld [vmem:[#allocation2] sm:$0xff]  ;;  %v24_v1 = vld [vmem:[#allocation2 + $0x8] sm:$0xff]  ;;  %s109_s11 = smov [#allocation5]   ;;  %s44_s14 = sshll.u32 %s127_s1, 4  ;;  %s45_s14 = int_to_ptr.hbm [resolvable:$true] %s44_s14 }
   0x6   :  { %v25_v2 = vadd.f32 3.0, %v23_v0  ;;  %v26_v3 = vadd.f32 3.0, %v24_v1  ;;  %s42_s12 = sshll.u32 %s109_s11, 4  ;;  %s43_s12 = int_to_ptr.vmem [resolvable:$true] %s42_s12 }
   0x8   :  { %v27_v4 = vmax.f32 %v25_v2, 0.0  ;;  %v28_v5 = vmax.f32 %v26_v3, 0.0 }
   0xa   :  { %v29_v6 = vmin.f32 %v27_v4, 6.0  ;;  %v30_v7 = vmin.f32 %v28_v5, 6.0 }
   0xc   :  { %v31_v8 = vmul.f32 0.16666667, %v29_v6  ;;  %v32_v9 = vmul.f32 0.16666667, %v30_v7 }
   0xe   :  { %v33_v10 = vmul.f32 %v31_v8, %v23_v0  ;;  %v34_v11 = vmul.f32 %v32_v9, %v24_v1 }
  0x10   :  { %35 = vst [vmem:[#allocation5] sm:$0xff] %v33_v10 }
  0x11   :  { %36 = vst [vmem:[#allocation5 + $0x8] sm:$0xff] %v34_v11 }
  0x12   :  { %47 = dma.vmem_to_hbm [thread:$0]  %s43_s12, 256, %s45_s14, [#allocation4]  }
  0x13   :  { %106 = dma.done.wait [#allocation4], 256  }
  0x14   :  { %107 = vsyncadd [#allocation4], 4294967040 }
  0x15   :  { %52 = vsyncpa [#allocation3], 1 }
  0x16   :  { %53 = vsyncpa [#allocation4], 1 }

</bundles_post_ra>
